<compile_context>
chip_gen: v7x
topology: tpu7x:2x2x1
jax: 0.10.0
libtpu: 0.0.40
codegen_flags: <defaults>
</compile_context>

<pallas_src>
import functools

import jax
import jax.numpy as jnp
from jax.experimental import pallas as pl
from jax.experimental.pallas import tpu as pltpu


def _pw_kernel(K, slope0_ref, sdiff_ref, points_ref, x_ref, o_ref):
    """slope0_ref: SMEM (1,), sdiff_ref/points_ref: SMEM (max(K,1),), x/o: VMEM tiles."""
    x = x_ref[...]
    ans = slope0_ref[0] * x
    if K > 0:  # K is a static Python int -> loop fully unrolled
        absx = jnp.abs(x)
        acc = sdiff_ref[0] * jnp.maximum(absx - points_ref[0], 0.0)
        for k in range(1, K):
            acc = acc + sdiff_ref[k] * jnp.maximum(absx - points_ref[k], 0.0)
        # points = exp(log_points) > 0, so acc == 0 exactly at x == 0; the select is
        # therefore numerically identical to sign(x) * acc (cheaper on the VPU).
        ans = ans + jnp.where(x < 0.0, -acc, acc)
    o_ref[...] = ans.astype(o_ref.dtype)


def piecewise_linear(x, log_points, log_slopes, *, lane_width=2048, block_rows=256):
    """Forward pass of Piecewise_Linear.

    x:          arbitrary-shaped float tensor (the op is purely elementwise)
    log_points: (K, 1, 1) float32
    log_slopes: (K+1, 1, 1) float32
    """
    K = int(log_points.shape[0])
    dtype = x.dtype

    # Parameter transforms (tiny, stay in plain JAX / SMEM).
    slope = jnp.exp(log_slopes.reshape(-1)).astype(jnp.float32)      # (K+1,)
    slope0 = slope[0:1]                                              # (1,)
    if K > 0:
        points = jnp.exp(log_points.reshape(-1)).astype(jnp.float32)  # (K,)
        slope_diff = slope[1:] - slope[:-1]                            # (K,)
    else:
        points = jnp.zeros((1,), jnp.float32)
        slope_diff = jnp.zeros((1,), jnp.float32)

    orig_shape = x.shape
    total = x.size

    # Flatten to a lane-dense 2-D slab (R, L); pad the tail with zeros (discarded later).
    L = max(128, (int(lane_width) // 128) * 128)
    xf = x.reshape(-1)
    pad = (-total) % L
    if pad:
        xf = jnp.concatenate([xf, jnp.zeros((pad,), dtype)])
    R = xf.size // L
    x2 = xf.reshape(R, L)

    # Row-block size: full R when tiny; otherwise a multiple of 8 sublanes, capped so
    # the 1-D grid has >= 2 steps (megacore) and the per-buffer tile stays ~<= 2 MiB.
    if R <= 8:
        bb = R
    else:
        bb = min(block_rows, max(8, (pl.cdiv(R, 2) // 8) * 8))
    grid = (pl.cdiv(R, bb),)

    kernel = functools.partial(_pw_kernel, K)
    out2 = pl.pallas_call(
        kernel,
        out_shape=jax.ShapeDtypeStruct((R, L), dtype),
        grid=grid,
        in_specs=[
            pl.BlockSpec(memory_space=pltpu.SMEM),        # slope0      (1,)
            pl.BlockSpec(memory_space=pltpu.SMEM),        # slope_diff  (max(K,1),)
            pl.BlockSpec(memory_space=pltpu.SMEM),        # points      (max(K,1),)
            pl.BlockSpec((bb, L), lambda i: (i, 0)),      # x tile
        ],
        out_specs=pl.BlockSpec((bb, L), lambda i: (i, 0)),
        compiler_params=pltpu.CompilerParams(
            dimension_semantics=("parallel",),
            vmem_limit_bytes=32 * 1024 * 1024,            # explicit headroom, safe on v5e/v6e/v7x
        ),
    )(slope0, slope_diff, points, x2)

    out = out2.reshape(-1)
    if pad:
        out = out[:total]
    return out.reshape(orig_shape)


def ref_forward(x, log_points, log_slopes):
    """Pure-JAX reference mirroring the PyTorch forward exactly."""
    slope = jnp.exp(log_slopes)                 # (K+1,1,1)
    points = jnp.exp(log_points)                # (K,1,1)
    slope0, slope_diff = slope[0], slope[1:] - slope[:-1]
    ans = slope0 * x
    if log_points.shape[0] > 0:
        ans = ans + jnp.sign(x) * jnp.sum(
            slope_diff * jnp.maximum(jnp.abs(x) - points, 0.0), axis=0)
    return ans


if __name__ == "__main__":
    key = jax.random.PRNGKey(0)

    # Module construction: pw_init gives K points; shapes per __init__.
    pw_init = [0.5, 1.0, 2.0]
    K = len(pw_init)
    log_points = jnp.log(jnp.asarray(pw_init, jnp.float32)).reshape(-1, 1, 1)  # (K,1,1)
    # __init__ uses zeros for log_slopes; use small deterministic nonzero values
    # so the piecewise branch is actually exercised numerically.
    log_slopes = jnp.linspace(-0.2, 0.3, K + 1, dtype=jnp.float32).reshape(-1, 1, 1)

    # Small 2-D input (the module's (K,1,1) params broadcast against 2-D x).
    # 64 x 300 is deliberately NOT a multiple of the lane width, exercising the
    # flatten + pad + multi-block (2 grid steps, partial last block) path.
    B, N = 64, 300
    x = jax.random.normal(key, (B, N), dtype=jnp.float32) * 3.0

    out = piecewise_linear(x, log_points, log_slopes)
    out = jax.block_until_ready(out)

    ref = ref_forward(x, log_points, log_slopes)
    assert out.shape == ref.shape and out.dtype == ref.dtype
    assert jnp.allclose(out, ref, atol=1e-5, rtol=1e-5), (
        float(jnp.max(jnp.abs(out - ref))))

    print("KERNEL_OK")
</pallas_src>

<mosaic_0001>
module attributes {stable_mosaic.version = 11 : i64} {
  func.func @_pw_kernel(%arg0: i32, %arg1: memref<1xf32, #tpu.memory_space<smem>>, %arg2: memref<3xf32, #tpu.memory_space<smem>>, %arg3: memref<3xf32, #tpu.memory_space<smem>>, %arg4: memref<8x2048xf32, #tpu.memory_space<vmem>>, %arg5: memref<8x2048xf32, #tpu.memory_space<vmem>>) attributes {dimension_semantics = [#tpu.dimension_semantics<parallel>], iteration_bounds = array<i64: 2>, scalar_prefetch = 0 : i64, scratch_operands = 0 : i64, tpu.core_type = #tpu.core_type<tc>, window_params = [{transform_indices = @transform_0, window_bounds = array<i64: 1>}, {transform_indices = @transform_1, window_bounds = array<i64: 3>}, {transform_indices = @transform_2, window_bounds = array<i64: 3>}, {transform_indices = @transform_3, window_bounds = array<i64: 8, 2048>}, {transform_indices = @transform_4, window_bounds = array<i64: 8, 2048>}]} {
    %c0 = arith.constant 0 : index
    %c0_0 = arith.constant 0 : index
    %0 = vector.load %arg4[%c0, %c0_0] : memref<8x2048xf32, #tpu.memory_space<vmem>>, vector<8x2048xf32>
    %c0_1 = arith.constant 0 : index
    %1 = memref.load %arg1[%c0_1] : memref<1xf32, #tpu.memory_space<smem>>
    %2 = vector.broadcast %1 : f32 to vector<8x2048xf32>
    %3 = arith.mulf %2, %0 : vector<8x2048xf32>
    %4 = math.absf %0 : vector<8x2048xf32>
    %c0_2 = arith.constant 0 : index
    %5 = memref.load %arg2[%c0_2] : memref<3xf32, #tpu.memory_space<smem>>
    %c0_3 = arith.constant 0 : index
    %6 = memref.load %arg3[%c0_3] : memref<3xf32, #tpu.memory_space<smem>>
    %7 = vector.broadcast %6 : f32 to vector<8x2048xf32>
    %8 = arith.subf %4, %7 : vector<8x2048xf32>
    %cst = arith.constant 0.000000e+00 : f32
    %9 = vector.broadcast %cst : f32 to vector<8x2048xf32>
    %10 = arith.maximumf %8, %9 : vector<8x2048xf32>
    %11 = vector.broadcast %5 : f32 to vector<8x2048xf32>
    %12 = arith.mulf %11, %10 : vector<8x2048xf32>
    %c1 = arith.constant 1 : index
    %13 = memref.load %arg2[%c1] : memref<3xf32, #tpu.memory_space<smem>>
    %c1_4 = arith.constant 1 : index
    %14 = memref.load %arg3[%c1_4] : memref<3xf32, #tpu.memory_space<smem>>
    %15 = vector.broadcast %14 : f32 to vector<8x2048xf32>
    %16 = arith.subf %4, %15 : vector<8x2048xf32>
    %cst_5 = arith.constant 0.000000e+00 : f32
    %17 = vector.broadcast %cst_5 : f32 to vector<8x2048xf32>
    %18 = arith.maximumf %16, %17 : vector<8x2048xf32>
    %19 = vector.broadcast %13 : f32 to vector<8x2048xf32>
    %20 = arith.mulf %19, %18 : vector<8x2048xf32>
    %21 = arith.addf %12, %20 : vector<8x2048xf32>
    %c2 = arith.constant 2 : index
    %22 = memref.load %arg2[%c2] : memref<3xf32, #tpu.memory_space<smem>>
    %c2_6 = arith.constant 2 : index
    %23 = memref.load %arg3[%c2_6] : memref<3xf32, #tpu.memory_space<smem>>
    %24 = vector.broadcast %23 : f32 to vector<8x2048xf32>
    %25 = arith.subf %4, %24 : vector<8x2048xf32>
    %cst_7 = arith.constant 0.000000e+00 : f32
    %26 = vector.broadcast %cst_7 : f32 to vector<8x2048xf32>
    %27 = arith.maximumf %25, %26 : vector<8x2048xf32>
    %28 = vector.broadcast %22 : f32 to vector<8x2048xf32>
    %29 = arith.mulf %28, %27 : vector<8x2048xf32>
    %30 = arith.addf %21, %29 : vector<8x2048xf32>
    %cst_8 = arith.constant 0.000000e+00 : f32
    %31 = vector.broadcast %cst_8 : f32 to vector<8x2048xf32>
    %32 = arith.cmpf olt, %0, %31 : vector<8x2048xf32>
    %cst_9 = arith.constant 0.000000e+00 : f32
    %33 = vector.broadcast %cst_9 : f32 to vector<8x2048xf32>
    %34 = arith.subf %33, %30 : vector<8x2048xf32>
    %35 = arith.select %32, %34, %30 : vector<8x2048xi1>, vector<8x2048xf32>
    %36 = arith.addf %3, %35 : vector<8x2048xf32>
    %c0_10 = arith.constant 0 : index
    %c0_11 = arith.constant 0 : index
    %37 = vector.load %arg5[%c0_10, %c0_11] : memref<8x2048xf32, #tpu.memory_space<vmem>>, vector<8x2048xf32>
    tpu.vector_store %arg5[%c0_10, %c0_11], %36 {strides = array<i32>} : memref<8x2048xf32, #tpu.memory_space<vmem>>, vector<8x2048xf32>,
    return
  }
  func.func @transform_0(%arg0: i32) -> i32 {
    %c0_i32 = arith.constant 0 : i32
    %c0_i32_0 = arith.constant 0 : i32
    return %c0_i32 : i32
  }
  func.func @transform_1(%arg0: i32) -> i32 {
    %c0_i32 = arith.constant 0 : i32
    %c0_i32_0 = arith.constant 0 : i32
    return %c0_i32 : i32
  }
  func.func @transform_2(%arg0: i32) -> i32 {
    %c0_i32 = arith.constant 0 : i32
    %c0_i32_0 = arith.constant 0 : i32
    return %c0_i32 : i32
  }
  func.func @transform_3(%arg0: i32) -> (i32, i32) {
    %c0_i32 = arith.constant 0 : i32
    %c0_i32_0 = arith.constant 0 : i32
    return %arg0, %c0_i32 : i32, i32
  }
  func.func @transform_4(%arg0: i32) -> (i32, i32) {
    %c0_i32 = arith.constant 0 : i32
    %c0_i32_0 = arith.constant 0 : i32
    return %arg0, %c0_i32 : i32, i32
  }
}

</mosaic_0001>

<bundles_post_ra>
// kernel: tpu_custom_call.1
= control target key start
LH: loop header
LB: loop body
LE: loop exit
PB: predicated region body
PF: predicated region fallthrough
CT: control target
= control target key end

     0   :  { %s1398_s0 = inlined_call_operand.<no memory space> [shape: f32[1], index: 0, kind: input, shape index: {}]   ;;  %s1399_s1 = inlined_call_operand.vmem [shape: f32[3], index: 1, kind: input, shape index: {}]   ;;  %s1400_s2 = inlined_call_operand.vmem [shape: f32[3], index: 2, kind: input, shape index: {}]   ;;  %s1401_s3 = inlined_call_operand.hbm [shape: f32[10,2048], index: 3, kind: input, shape index: {}]   ;;  %s1402_s4 = inlined_call_operand.hbm [shape: f32[10,2048], index: 4, kind: output, shape index: {}]  }
   0x1   :  { %9 = sst [smem:[#allocation2]] %s1398_s0 }
   0x2   :  { %10 = vsyncpa [#allocation6], 0 }
   0x3   :  { %11 = vsyncpa [#allocation8], 0 }
   0x4   :  { %12 = vsyncpa [#allocation4], 0 }
   0x5   :  { %14 = vsyncpa [#allocation4 + $0x1], 0 }
   0x6   :  { %15 = vsyncpa [#allocation5], 0 }
   0x7   :  { %17 = vsyncpa [#allocation5 + $0x1], 0  ;;  %s926_s17 = smov 0   ;;  %s928_s18 = smov 0  }
   0x8   :  { %s930_s19 = smov 0   ;;  %s932_s20 = smov 0  }
   0x9 LB: > { %s947_s0 = sadd.s32 4294967295, %s892_s20   ;;  %s667_s21 = sadd.s32 4294967294, %s892_s20   ;;  %s892_s20 = sphi %s932_s20, %s1424_s20   ;;  %s888_s19 = sphi %s930_s19, %s1423_s19   ;;  %s884_s18 = sphi %s928_s18, %s1422_s18   ;;  %s880_s17 = sphi %s926_s17, %s1421_s17  }
   0xa   : > { %p106_p0 = scmp.ne.s32.totalorder %s884_s18, %s880_s17  ;;  %p1403_p1 = scmp.eq.s32.totalorder %s947_s0, 0 }
   0xb   : > { %p136_p3 = scmp.eq.s32.totalorder %s667_s21, 1  ;;  %p668_p5 = scmp.ge.s32.totalorder %s892_s20, 1 }
   0xc   : > { %p956_p4 = por %p1403_p1, %p106_p0  ;;  %p143_p7 = scmp.lt.s32.totalorder %s892_s20, 3 }
   0xd   : > { %p961_p6 = por %p136_p3, %p106_p0  ;;  %s159_s26 = sshll.u32 %s1399_s1, 4  ;;  %s160_s26 = int_to_ptr.vmem [resolvable:$true] %s159_s26 }
   0xe   : > { %s1406_s22 = scalar_select %p956_p4, 1, 0 }
   0xf   : > { %s1407_s23 = scalar_select %p961_p6, 1, 0 }
  0x10   : > { %p969_p8 = pnand %p668_p5, %p143_p7  ;;  %s170_s30 = sshll.u32 %s1400_s2, 4  ;;  %s171_s30 = int_to_ptr.vmem [resolvable:$true] %s170_s30 }
  0x11   : > { %s986_s6 = sadd.s32 1, %s892_s20   ;;  %s758_s8 = scalar_lea.vmem %s160_s26, 16 }
  0x12   : > { %s1408_s27 = scalar_select %p969_p8, 1, 0 }
  0x13   : > { %p703_p10 = pneg %p969_p8  ;;  %s90_s7 = ssub.s32 %s892_s20, %s986_s6 }
  0x14   : > { %p759_p12 = scmp.ne.s32.totalorder %s160_s26, %s758_s8  ;;  %p766_p5 = scmp.lt.s32.totalorder %s160_s26, %s160_s26 }
  0x15   : > { %p981_p11 = pnand %p703_p10, %p1403_p1  ;;  %p767_p7 = scmp.lt.s32.totalorder %s758_s8, %s758_s8 }
  0x17   : > { %p760_p13 = pneg %p981_p11  ;;  %p768_p9 = por %p767_p7, %p766_p5 }
  0x19   : > { %p761_p0 = pnand %p760_p13, %p759_p12 }
  0x1b   : > { %p762_p3 = pneg %p761_p0 }
  0x1d   : > { %p769_p2 = pnand %p768_p9, %p762_p3 }
  0x1f   : > { %772 = shalt.err (!%p769_p2)
}
  0x20   : > { %s894_s9 = smov [#allocation3]   ;;  %s773_s10 = scalar_lea.vmem %s171_s30, 16 }
  0x21   : > { %706 = dma.vmem_to_smem (!%p981_p11), %s160_s26, 16, %s894_s9, [#allocation6]  }
  0x22   : > { %p774_p10 = scmp.ne.s32.totalorder %s171_s30, %s773_s10  ;;  %p781_p4 = scmp.lt.s32.totalorder %s171_s30, %s171_s30 }
  0x23   : > { %p782_p8 = scmp.lt.s32.totalorder %s773_s10, %s773_s10 }
  0x24   : > { %p776_p1 = pnand %p774_p10, %p760_p13 }
  0x25   : > { %p783_p12 = por %p782_p8, %p781_p4 }
  0x26   : > { %p777_p6 = pneg %p776_p1 }
  0x28   : > { %p784_p0 = pnand %p783_p12, %p777_p6 }
  0x2a   : > { %787 = shalt.err (!%p784_p0)
}
  0x2b   : > { %s895_s11 = smov [#allocation7]   ;;  %p91_p2 = scmp.eq.s32.totalorder %s90_s7, 0 }
  0x2c   : > { %709 = dma.vmem_to_smem (!%p981_p11), %s171_s30, 16, %s895_s11, [#allocation8]  }
  0x2d   : > { %s93_s12 = sadd.s32 1, %s888_s19  ;;  %p100_p1 = scmp.ne.s32.totalorder %s888_s19, %s884_s18 }
  0x2e   : > { %p101_p9 = scmp.eq.s32.totalorder %s892_s20, 0  ;;  %p1410_p6 = scmp.eq.s32.totalorder %s947_s0, 1 }
  0x2f   : > { %s1001_s13 = scalar_select %p91_p2, %s888_s19, %s93_s12  }
  0x30   : > { %p102_p4 = por %p101_p9, %p100_p1  ;;  %p1005_p8 = por %p1410_p6, %p100_p1 }
  0x31   : > { %p720_p13 = scmp.lt.s32.totalorder %s892_s20, 2  ;;  %s181_s15 = sand.u32 1, %s888_s19  }
  0x32   : > { %s672_s16 = sshll.u32 %s181_s15, 7  ;;  %s689_s21 = sshll.u32 %s892_s20, 11 }
  0x33   : > { %s1015_s26 = scalar_lea.hbm %s1401_s3, %s689_s21  ;;  %s185_s28 = scalar_lea.vmem [#allocation9], %s672_s16 }
  0x34   : > { %s193_s29 = sshll.u32 %s185_s28, 4  ;;  %p1019_p11 = pnand %p720_p13, %p102_p4  ;;  %s1017_s29 = int_to_ptr.vmem [resolvable:$true] %s193_s29 }
  0x35   : > { %s182_s5 = scalar_lea.sflag [#allocation4], %s181_s15  ;;  %s788_s7 = scalar_lea.hbm %s1015_s26, 2048 }
  0x36   : > { %p789_p3 = scmp.ne.s32.totalorder %s1015_s26, %s788_s7  ;;  %p790_p5 = pneg %p1019_p11 }
  0x37   : > { %s793_s10 = scalar_lea.hbm %s1401_s3, 4096  ;;  %p794_p12 = scmp.lt.u32.totalorder %s1015_s26, %s1401_s3 }
  0x38   : > { %p791_p7 = pnand %p790_p5, %p789_p3  ;;  %p795_p0 = scmp.lt.u32.totalorder %s793_s10, %s788_s7 }
  0x39   : > { %p797_p1 = scmp.lt.u32.totalorder %s788_s7, %s1015_s26 }
  0x3a   : > { %p792_p10 = pneg %p791_p7  ;;  %p796_p2 = por %p795_p0, %p794_p12 }
  0x3c   : > { %p798_p9 = por %p797_p1, %p796_p2 }
  0x3e   : > { %p799_p4 = pnand %p798_p9, %p792_p10 }
  0x40   : > { %802 = shalt.err (!%p799_p4)
}
  0x41   : > { %s803_s15 = scalar_lea.vmem %s1017_s29, 2048  ;;  %s896_s16 = smov [#allocation9]  }
  0x42   : > { %p804_p6 = scmp.ne.s32.totalorder %s1017_s29, %s803_s15  ;;  %s808_s21 = sshll.u32 %s896_s16, 4  ;;  %s809_s21 = int_to_ptr.vmem [resolvable:$false] %s808_s21 }
  0x43   : > { %s810_s24 = scalar_lea.vmem %s809_s21, 4096  ;;  %p811_p7 = scmp.lt.s32.totalorder %s1017_s29, %s809_s21 }
  0x44   : > { %p806_p13 = pnand %p804_p6, %p790_p5  ;;  %p812_p12 = scmp.lt.s32.totalorder %s810_s24, %s803_s15 }
  0x46   : > { %p807_p3 = pneg %p806_p13  ;;  %p813_p0 = por %p812_p12, %p811_p7 }
  0x48   : > { %p814_p2 = pnand %p813_p0, %p807_p3 }
  0x4a   : > { %817 = shalt.err (!%p814_p2)
}
  0x4b   : > { %713 = dma.hbm_to_vmem [thread:$0]  (!%p1019_p11), %s1015_s26, 2048, %s1017_s29, %s182_s5  }
  0x4c   : > { %p1413_p10 = scmp.ne.s32.totalorder %s1408_s27, 0 }
  0x4d   : > { %p1414_p5 = scmp.eq.s32.totalorder (!%p1413_p10), %s947_s0, 0 }
  0x4e   : > { %202 = sbr.rel (%p1413_p10) target bundleno = 191 (0xbf), region = 36 }
  0x55   : > { %863 = dma.done.wait (%p1414_p5), [#allocation6], 16   ;;  %p1415_p1 = pmov %p1414_p5 }
  0x57   : > { %865 = vsyncadd (%p1415_p1), [#allocation6], 4294967280  ;;  %p1416_p9 = pmov %p1415_p1 }
  0x58   : > { %p1417_p4 = pmov %p1415_p1 }
  0x59   : > { %867 = dma.done.wait (%p1416_p9), [#allocation8], 16  }
  0x5a   : > { %869 = vsyncadd (%p1417_p4), [#allocation8], 4294967280  ;;  %s1059_s25 = sand.u32 1, %s884_s18   ;;  %p1418_p11 = scmp.ne.s32.totalorder %s1406_s22, 0 }
  0x5b   : > { %s678_s27 = sshll.u32 %s1059_s25, 7  ;;  %s213_s26 = scalar_lea.sflag [#allocation4], %s1059_s25 }
  0x5c   : > { %s1065_s28 = scalar_lea.vmem [#allocation9], %s678_s27 }
  0x5d   : > { %871 = dma.done.wait (%p1418_p11), %s213_s26, 2048  }
  0x5e   : > { %873 = vsyncadd (%p1418_p11), %s213_s26, 4294965248 }
  0x5f   : > { %221 = sfence }
  0x60   : > { %v1072_v0 = vld [vmem:[%s1065_s28] sm:$0xff]  ;;  %s258_s29 = sld [smem:[#allocation2]]  ;;  %v1075_v1 = vld [vmem:[%s1065_s28 + $0x8] sm:$0xff]  ;;  %s680_s7 = sld [smem:[#allocation3 + $0x1]]  ;;  %v1078_v2 = vld [vmem:[%s1065_s28 + $0x10] sm:$0xff] }
  0x61   : > { %s292_s30 = sld [smem:[#allocation3]]  ;;  %s681_s8 = sld [smem:[#allocation7 + $0x1]]  ;;  %v276_v3 = vand.u32 2147483647, %v1072_v0  ;;  %v277_v4 = vand.u32 2147483647, %v1075_v1 }
  0x62   : > { %s293_s5 = sld [smem:[#allocation7]]  ;;  %s682_s22 = sld [smem:[#allocation3 + $0x2]]  ;;  %v1083_v5 = vld [vmem:[%s1065_s28 + $0x18] sm:$0xff]  ;;  %v1086_v6 = vld [vmem:[%s1065_s28 + $0x20] sm:$0xff]  ;;  %v1089_v7 = vld [vmem:[%s1065_s28 + $0x28] sm:$0xff]  ;;  %vm480_vm0 = vcmp.lt.f32.partialorder %v1072_v0, 0.0 }
  0x63   : > { %s683_s9 = sld [smem:[#allocation7 + $0x2]]  ;;  %v278_v9 = vand.u32 2147483647, %v1078_v2  ;;  %v279_v10 = vand.u32 2147483647, %v1083_v5  ;;  %vm481_vm1 = vcmp.lt.f32.partialorder %v1075_v1, 0.0 }
  0x64   : > { %v1102_v13 = vand.u32 2147483647, %v1086_v6  ;;  %v1105_v14 = vand.u32 2147483647, %v1089_v7  ;;  %vm482_vm2 = vcmp.lt.f32.partialorder %v1078_v2, 0.0  ;;  %vm483_vm3 = vcmp.lt.f32.partialorder %v1083_v5, 0.0 }
  0x65   : > { %s1163_s10 = scalar_lea.vmem [#allocation10], %s678_s27  ;;  %vm484_vm4 = vcmp.lt.f32.partialorder %v1086_v6, 0.0  ;;  %vm485_vm5 = vcmp.lt.f32.partialorder %v1089_v7, 0.0  ;;  %s690_s11 = sshll.u32 %s947_s0, 11 }
  0x66   : > { %v1091_v8 = vstv %s258_s29  ;;  %v1114_v20 = vstv %s680_s7  ;;  %s575_s12 = sshll.u32 %s1163_s10, 4  ;;  %s1353_s21 = scalar_lea.hbm %s1402_s4, %s690_s11  ;;  %s1355_s12 = int_to_ptr.vmem [resolvable:$true] %s575_s12 }
  0x67   : > { %v1097_v11 = vmul.f32 %v1091_v8, %v1072_v0  ;;  %v1108_v16 = vstv %s292_s30  ;;  %v1110_v17 = vstv %s681_s8  ;;  %v261_v40 = vmul.f32 %v1091_v8, %v1075_v1  ;;  %s561_s24 = scalar_lea.sflag [#allocation5], %s1059_s25  ;;  %s818_s27 = scalar_lea.vmem %s1355_s12, 2048 }
  0x68   : > { %v1099_v12 = vstv %s293_s5  ;;  %v347_v19 = vsub.f32 %v276_v3, %v1110_v17  ;;  %v348_v22 = vsub.f32 %v277_v4, %v1110_v17  ;;  %v1123_v28 = vstv %s682_s22  ;;  %p819_p6 = scmp.ne.s32.totalorder %s1355_s12, %s818_s27  ;;  %s897_s0 = smov [#allocation10]  }
  0x69   : > { %v295_v15 = vsub.f32 %v276_v3, %v1099_v12  ;;  %v296_v18 = vsub.f32 %v277_v4, %v1099_v12  ;;  %v1116_v21 = vstv %s683_s9  ;;  %v297_v30 = vsub.f32 %v278_v9, %v1099_v12  ;;  %s822_s26 = sshll.u32 %s897_s0, 4  ;;  %s823_s26 = int_to_ptr.vmem [resolvable:$false] %s822_s26 }
  0x6a   : > { %v415_v24 = vsub.f32 %v276_v3, %v1116_v21  ;;  %v416_v26 = vsub.f32 %v277_v4, %v1116_v21  ;;  %v363_v27 = vmax.f32 %v347_v19, 0.0  ;;  %v364_v29 = vmax.f32 %v348_v22, 0.0  ;;  %p820_p13 = pnand %p819_p6, %p1005_p8  ;;  %p825_p7 = scmp.lt.s32.totalorder %s1355_s12, %s823_s26 }
  0x6b   : > { %v311_v23 = vmax.f32 %v295_v15, 0.0  ;;  %v312_v25 = vmax.f32 %v296_v18, 0.0  ;;  %v313_v37 = vmax.f32 %v297_v30, 0.0  ;;  %v349_v38 = vsub.f32 %v278_v9, %v1110_v17 }
  0x6c   : > { %v431_v32 = vmax.f32 %v415_v24, 0.0  ;;  %v432_v34 = vmax.f32 %v416_v26, 0.0  ;;  %v380_v35 = vmul.f32 %v1114_v20, %v363_v27  ;;  %v381_v36 = vmul.f32 %v1114_v20, %v364_v29  ;;  %p821_p3 = pneg %p820_p13 }
  0x6d   : > { %v328_v31 = vmul.f32 %v1108_v16, %v311_v23  ;;  %v329_v33 = vmul.f32 %v1108_v16, %v312_v25  ;;  %v417_v42 = vsub.f32 %v278_v9, %v1116_v21  ;;  %v330_v45 = vmul.f32 %v1108_v16, %v313_v37 }
  0x6e   : > { %v448_v39 = vmul.f32 %v1123_v28, %v431_v32  ;;  %v449_v41 = vmul.f32 %v1123_v28, %v432_v34  ;;  %v365_v46 = vmax.f32 %v349_v38, 0.0  ;;  %v298_v48 = vsub.f32 %v279_v10, %v1099_v12 }
  0x6f   : > { %v396_v43 = vadd.f32 %v380_v35, %v328_v31  ;;  %v397_v44 = vadd.f32 %v381_v36, %v329_v33  ;;  %v433_v47 = vmax.f32 %v417_v42, 0.0  ;;  %v350_v49 = vsub.f32 %v279_v10, %v1110_v17  ;;  %v1173_v31 = vld [vmem:[%s1065_s28 + $0x30] sm:$0xff] }
  0x70   : > { %v418_v50 = vsub.f32 %v279_v10, %v1116_v21  ;;  %v262_v53 = vmul.f32 %v1091_v8, %v1078_v2  ;;  %v382_v54 = vmul.f32 %v1114_v20, %v365_v46  ;;  %v314_v56 = vmax.f32 %v298_v48, 0.0  ;;  %v1184_v2 = vld [vmem:[%s1065_s28 + $0x38] sm:$0xff] }
  0x71   : > { %v464_v51 = vadd.f32 %v448_v39, %v396_v43  ;;  %v465_v52 = vadd.f32 %v449_v41, %v397_v44  ;;  %v450_v55 = vmul.f32 %v1123_v28, %v433_v47  ;;  %v366_v57 = vmax.f32 %v350_v49, 0.0 }
  0x72   : > { %v434_v58 = vmax.f32 %v418_v50, 0.0  ;;  %v398_v61 = vadd.f32 %v382_v54, %v330_v45  ;;  %v299_v62 = vsub.f32 %v1102_v13, %v1099_v12  ;;  %v331_v63 = vmul.f32 %v1108_v16, %v314_v56 }
  0x73   : > { %v496_v59 = vsub.f32 0.0, %v464_v51  ;;  %v497_v60 = vsub.f32 0.0, %v465_v52  ;;  %v383_v3 = vmul.f32 %v1114_v20, %v366_v57  ;;  %v351_v9 = vsub.f32 %v1102_v13, %v1110_v17 }
  0x74   : > { %v451_v4 = vmul.f32 %v1123_v28, %v434_v58  ;;  %v466_v18 = vadd.f32 %v450_v55, %v398_v61  ;;  %v315_v19 = vmax.f32 %v299_v62, 0.0  ;;  %v419_v0 = vsub.f32 %v1102_v13, %v1116_v21 }
  0x75   : > { %v512_v10 = vsel %vm480_vm0, %v496_v59, %v464_v51  ;;  %v513_v15 = vsel %vm481_vm1, %v497_v60, %v465_v52  ;;  %v399_v24 = vadd.f32 %v383_v3, %v331_v63  ;;  %v367_v25 = vmax.f32 %v351_v9, 0.0  ;;  %v1209_v63 = vld [vmem:[%s1065_s28 + $0x40] sm:$0xff] }
  0x76   : > { %v528_v22 = vadd.f32 %v512_v10, %v1097_v11  ;;  %v529_v23 = vadd.f32 %v513_v15, %v261_v40  ;;  %v498_v26 = vsub.f32 0.0, %v466_v18  ;;  %v332_v27 = vmul.f32 %v1108_v16, %v315_v19 }
  0x77   : > { %v467_v1 = vadd.f32 %v451_v4, %v399_v24  ;;  %v384_v11 = vmul.f32 %v1114_v20, %v367_v25  ;;  %v300_v29 = vsub.f32 %v1105_v14, %v1099_v12  ;;  %v352_v30 = vsub.f32 %v1105_v14, %v1110_v17  ;;  %v1220_v25 = vld [vmem:[%s1065_s28 + $0x48] sm:$0xff] }
  0x78   : > { %544 = vst [vmem:[%s1163_s10] sm:$0xff] %v528_v22  ;;  %545 = vst [vmem:[%s1163_s10 + $0x8] sm:$0xff] %v529_v23  ;;  %v514_v13 = vsel %vm482_vm2, %v498_v26, %v466_v18  ;;  %v263_v32 = vmul.f32 %v1091_v8, %v1083_v5  ;;  %v435_v33 = vmax.f32 %v419_v0, 0.0  ;;  %v420_v34 = vsub.f32 %v1105_v14, %v1116_v21 }
  0x79   : > { %v530_v35 = vadd.f32 %v514_v13, %v262_v53  ;;  %v499_v36 = vsub.f32 0.0, %v467_v1  ;;  %v400_v37 = vadd.f32 %v384_v11, %v332_v27  ;;  %v316_v38 = vmax.f32 %v300_v29, 0.0 }
  0x7a   : > { %v452_v39 = vmul.f32 %v1123_v28, %v435_v33  ;;  %v368_v40 = vmax.f32 %v352_v30, 0.0  ;;  %v436_v41 = vmax.f32 %v420_v34, 0.0  ;;  %v282_v42 = vand.u32 2147483647, %v1173_v31 }
  0x7b   : > { %546 = vst [vmem:[%s1163_s10 + $0x10] sm:$0xff] %v530_v35  ;;  %v515_v43 = vsel %vm483_vm3, %v499_v36, %v467_v1  ;;  %v264_v14 = vmul.f32 %v1091_v8, %v1086_v6  ;;  %v333_v44 = vmul.f32 %v1108_v16, %v316_v38  ;;  %v283_v51 = vand.u32 2147483647, %v1184_v2 }
  0x7c   : > { %v531_v45 = vadd.f32 %v515_v43, %v263_v32  ;;  %v468_v46 = vadd.f32 %v452_v39, %v400_v37  ;;  %v385_v47 = vmul.f32 %v1114_v20, %v368_v40  ;;  %v453_v48 = vmul.f32 %v1123_v28, %v436_v41 }
  0x7d   : > { %v301_v49 = vsub.f32 %v282_v42, %v1099_v12  ;;  %v353_v50 = vsub.f32 %v282_v42, %v1110_v17  ;;  %v421_v5 = vsub.f32 %v282_v42, %v1116_v21  ;;  %v265_v53 = vmul.f32 %v1091_v8, %v1089_v7  ;;  %v1238_v42 = vld [vmem:[%s1065_s28 + $0x50] sm:$0xff] }
  0x7e   : > { %547 = vst [vmem:[%s1163_s10 + $0x18] sm:$0xff] %v531_v45  ;;  %v500_v52 = vsub.f32 0.0, %v468_v46  ;;  %v401_v54 = vadd.f32 %v385_v47, %v333_v44  ;;  %v302_v58 = vsub.f32 %v283_v51, %v1099_v12  ;;  %v354_v61 = vsub.f32 %v283_v51, %v1110_v17 }
  0x7f   : > { %v317_v55 = vmax.f32 %v301_v49, 0.0  ;;  %v369_v56 = vmax.f32 %v353_v50, 0.0  ;;  %v437_v57 = vmax.f32 %v421_v5, 0.0  ;;  %v422_v62 = vsub.f32 %v283_v51, %v1116_v21 }
  0x80   : > { %v516_v59 = vsel %vm484_vm4, %v500_v52, %v468_v46  ;;  %v469_v60 = vadd.f32 %v453_v48, %v401_v54  ;;  %v318_v18 = vmax.f32 %v302_v58, 0.0  ;;  %v370_v19 = vmax.f32 %v354_v61, 0.0 }
  0x81   : > { %v532_v3 = vadd.f32 %v516_v59, %v264_v14  ;;  %v334_v4 = vmul.f32 %v1108_v16, %v317_v55  ;;  %v386_v9 = vmul.f32 %v1114_v20, %v369_v56  ;;  %v454_v10 = vmul.f32 %v1123_v28, %v437_v57 }
  0x82   : > { %v501_v15 = vsub.f32 0.0, %v469_v60  ;;  %v438_v6 = vmax.f32 %v422_v62, 0.0  ;;  %v266_v22 = vmul.f32 %v1091_v8, %v1173_v31  ;;  %vm486_vm6 = vcmp.lt.f32.partialorder %v1173_v31, 0.0 }
  0x83   : > { %548 = vst [vmem:[%s1163_s10 + $0x20] sm:$0xff] %v532_v3  ;;  %v402_v23 = vadd.f32 %v386_v9, %v334_v4  ;;  %v284_v24 = vand.u32 2147483647, %v1209_v63  ;;  %v335_v27 = vmul.f32 %v1108_v16, %v318_v18  ;;  %v387_v0 = vmul.f32 %v1114_v20, %v370_v19 }
  0x84   : > { %v517_v26 = vsel %vm485_vm5, %v501_v15, %v469_v60  ;;  %v455_v1 = vmul.f32 %v1123_v28, %v438_v6  ;;  %v267_v32 = vmul.f32 %v1091_v8, %v1184_v2  ;;  %v285_v34 = vand.u32 2147483647, %v1220_v25 }
  0x85   : > { %v533_v11 = vadd.f32 %v517_v26, %v265_v53  ;;  %v470_v29 = vadd.f32 %v454_v10, %v402_v23  ;;  %v303_v30 = vsub.f32 %v284_v24, %v1099_v12  ;;  %v355_v13 = vsub.f32 %v284_v24, %v1110_v17  ;;  %v1248_v53 = vld [vmem:[%s1065_s28 + $0x58] sm:$0xff]  ;;  %v1273_v26 = vld [vmem:[%s1065_s28 + $0x60] sm:$0xff] }
  0x86   : > { %v403_v33 = vadd.f32 %v387_v0, %v335_v27  ;;  %v423_v7 = vsub.f32 %v284_v24, %v1116_v21  ;;  %vm487_vm7 = vcmp.lt.f32.partialorder %v1184_v2, 0.0  ;;  %v304_v40 = vsub.f32 %v285_v34, %v1099_v12 }
  0x87   : > { %549 = vst [vmem:[%s1163_s10 + $0x28] sm:$0xff] %v533_v11  ;;  %v502_v35 = vsub.f32 0.0, %v470_v29  ;;  %v319_v36 = vmax.f32 %v303_v30, 0.0  ;;  %v371_v37 = vmax.f32 %v355_v13, 0.0  ;;  %v356_v41 = vsub.f32 %v285_v34, %v1110_v17 }
  0x88   : > { %v471_v38 = vadd.f32 %v455_v1, %v403_v33  ;;  %v439_v39 = vmax.f32 %v423_v7, 0.0  ;;  %v424_v45 = vsub.f32 %v285_v34, %v1116_v21  ;;  %v320_v49 = vmax.f32 %v304_v40, 0.0  ;;  %v1284_v34 = vld [vmem:[%s1065_s28 + $0x68] sm:$0xff] }
  0x89   : > { %v518_v43 = vsel %vm486_vm6, %v502_v35, %v470_v29  ;;  %v336_v14 = vmul.f32 %v1108_v16, %v319_v36  ;;  %v388_v44 = vmul.f32 %v1114_v20, %v371_v37  ;;  %v372_v5 = vmax.f32 %v356_v41, 0.0 }
  0x8a   : > { %v534_v46 = vadd.f32 %v518_v43, %v266_v22  ;;  %v503_v47 = vsub.f32 0.0, %v471_v38  ;;  %v456_v48 = vmul.f32 %v1123_v28, %v439_v39  ;;  %v440_v51 = vmax.f32 %v424_v45, 0.0 }
  0x8b   : > { %v404_v50 = vadd.f32 %v388_v44, %v336_v14  ;;  %v286_v52 = vand.u32 2147483647, %v1238_v42  ;;  %v268_v54 = vmul.f32 %v1091_v8, %v1209_v63  ;;  %vm488_vm8 = vcmp.lt.f32.partialorder %v1209_v63, 0.0 }
  0x8c   : > { %550 = vst [vmem:[%s1163_s10 + $0x30] sm:$0xff] %v534_v46  ;;  %v519_v31 = vsel %vm487_vm7, %v503_v47, %v471_v38  ;;  %v337_v55 = vmul.f32 %v1108_v16, %v320_v49  ;;  %v389_v58 = vmul.f32 %v1114_v20, %v372_v5  ;;  %v457_v59 = vmul.f32 %v1123_v28, %v440_v51 }
  0x8d   : > { %v535_v56 = vadd.f32 %v519_v31, %v267_v32  ;;  %v472_v57 = vadd.f32 %v456_v48, %v404_v50  ;;  %v305_v60 = vsub.f32 %v286_v52, %v1099_v12  ;;  %v357_v61 = vsub.f32 %v286_v52, %v1110_v17 }
  0x8e   : > { %v425_v2 = vsub.f32 %v286_v52, %v1116_v21  ;;  %v287_v62 = vand.u32 2147483647, %v1248_v53  ;;  %v269_v4 = vmul.f32 %v1091_v8, %v1220_v25  ;;  %v405_v9 = vadd.f32 %v389_v58, %v337_v55  ;;  %v1302_v52 = vld [vmem:[%s1065_s28 + $0x70] sm:$0xff] }
  0x8f   : > { %551 = vst [vmem:[%s1163_s10 + $0x38] sm:$0xff] %v535_v56  ;;  %v504_v3 = vsub.f32 0.0, %v472_v57  ;;  %vm489_vm9 = vcmp.lt.f32.partialorder %v1220_v25, 0.0  ;;  %v321_v10 = vmax.f32 %v305_v60, 0.0  ;;  %v373_v15 = vmax.f32 %v357_v61, 0.0 }
  0x90   : > { %v441_v18 = vmax.f32 %v425_v2, 0.0  ;;  %v306_v19 = vsub.f32 %v287_v62, %v1099_v12  ;;  %v473_v22 = vadd.f32 %v457_v59, %v405_v9  ;;  %v358_v23 = vsub.f32 %v287_v62, %v1110_v17 }
  0x91   : > { %v520_v6 = vsel %vm488_vm8, %v504_v3, %v472_v57  ;;  %v426_v24 = vsub.f32 %v287_v62, %v1116_v21  ;;  %v338_v0 = vmul.f32 %v1108_v16, %v321_v10  ;;  %v390_v1 = vmul.f32 %v1114_v20, %v373_v15 }
  0x92   : > { %v536_v27 = vadd.f32 %v520_v6, %v268_v54  ;;  %v458_v11 = vmul.f32 %v1123_v28, %v441_v18  ;;  %v505_v29 = vsub.f32 0.0, %v473_v22  ;;  %v322_v30 = vmax.f32 %v306_v19, 0.0 }
  0x93   : > { %v374_v13 = vmax.f32 %v358_v23, 0.0  ;;  %v442_v63 = vmax.f32 %v426_v24, 0.0  ;;  %v270_v32 = vmul.f32 %v1091_v8, %v1238_v42  ;;  %v406_v33 = vadd.f32 %v390_v1, %v338_v0 }
  0x94   : > { %552 = vst [vmem:[%s1163_s10 + $0x40] sm:$0xff] %v536_v27  ;;  %vm490_vm10 = vcmp.lt.f32.partialorder %v1238_v42, 0.0  ;;  %v288_v7 = vand.u32 2147483647, %v1273_v26  ;;  %v521_v35 = vsel %vm489_vm9, %v505_v29, %v473_v22  ;;  %v339_v36 = vmul.f32 %v1108_v16, %v322_v30 }
  0x95   : > { %v391_v37 = vmul.f32 %v1114_v20, %v374_v13  ;;  %v459_v38 = vmul.f32 %v1123_v28, %v442_v63  ;;  %v537_v39 = vadd.f32 %v521_v35, %v269_v4  ;;  %v474_v40 = vadd.f32 %v458_v11, %v406_v33  ;;  %v257_v4 = vld [vmem:[%s1065_s28 + $0x78] sm:$0xff]  ;;  %s824_s28 = scalar_lea.vmem %s823_s26, 4096 }
  0x96   : > { %v307_v41 = vsub.f32 %v288_v7, %v1099_v12  ;;  %v359_v43 = vsub.f32 %v288_v7, %v1110_v17  ;;  %v271_v14 = vmul.f32 %v1091_v8, %v1248_v53  ;;  %v427_v25 = vsub.f32 %v288_v7, %v1116_v21  ;;  %p826_p12 = scmp.lt.s32.totalorder %s824_s28, %s818_s27 }
  0x97   : > { %v407_v44 = vadd.f32 %v391_v37, %v339_v36  ;;  %v289_v45 = vand.u32 2147483647, %v1284_v34  ;;  %553 = vst [vmem:[%s1163_s10 + $0x48] sm:$0xff] %v537_v39  ;;  %v506_v46 = vsub.f32 0.0, %v474_v40  ;;  %vm491_vm11 = vcmp.lt.f32.partialorder %v1248_v53, 0.0 }
  0x98   : > { %v323_v47 = vmax.f32 %v307_v41, 0.0  ;;  %v375_v48 = vmax.f32 %v359_v43, 0.0  ;;  %v443_v50 = vmax.f32 %v427_v25, 0.0  ;;  %v290_v3 = vand.u32 2147483647, %v1302_v52  ;;  %p827_p0 = por %p826_p12, %p825_p7 }
  0x99   : > { %v475_v49 = vadd.f32 %v459_v38, %v407_v44  ;;  %v308_v5 = vsub.f32 %v289_v45, %v1099_v12  ;;  %v360_v51 = vsub.f32 %v289_v45, %v1110_v17  ;;  %v522_v31 = vsel %vm490_vm10, %v506_v46, %v474_v40 }
  0x9a   : > { %v340_v54 = vmul.f32 %v1108_v16, %v323_v47  ;;  %v392_v55 = vmul.f32 %v1114_v20, %v375_v48  ;;  %v428_v56 = vsub.f32 %v289_v45, %v1116_v21  ;;  %v538_v57 = vadd.f32 %v522_v31, %v270_v32  ;;  %p828_p2 = pnand %p827_p0, %p821_p3 }
  0x9b   : > { %v507_v58 = vsub.f32 0.0, %v475_v49  ;;  %v460_v59 = vmul.f32 %v1123_v28, %v443_v50  ;;  %v324_v60 = vmax.f32 %v308_v5, 0.0  ;;  %v376_v2 = vmax.f32 %v360_v51, 0.0 }
  0x9c   : > { %v408_v61 = vadd.f32 %v392_v55, %v340_v54  ;;  %v444_v62 = vmax.f32 %v428_v56, 0.0  ;;  %554 = vst [vmem:[%s1163_s10 + $0x50] sm:$0xff] %v538_v57  ;;  %v272_v9 = vmul.f32 %v1091_v8, %v1273_v26  ;;  %vm492_vm12 = vcmp.lt.f32.partialorder %v1273_v26, 0.0 }
  0x9d   : > { %v523_v42 = vsel %vm491_vm11, %v507_v58, %v475_v49  ;;  %v341_v10 = vmul.f32 %v1108_v16, %v324_v60  ;;  %v393_v19 = vmul.f32 %v1114_v20, %v376_v2  ;;  %v309_v22 = vsub.f32 %v290_v3, %v1099_v12 }
  0x9e   : > { %v539_v15 = vadd.f32 %v523_v42, %v271_v14  ;;  %v476_v18 = vadd.f32 %v460_v59, %v408_v61  ;;  %v461_v6 = vmul.f32 %v1123_v28, %v444_v62  ;;  %v361_v23 = vsub.f32 %v290_v3, %v1110_v17 }
  0x9f   : > { %v429_v53 = vsub.f32 %v290_v3, %v1116_v21  ;;  %v291_v24 = vand.u32 2147483647, %v257_v4  ;;  %v273_v0 = vmul.f32 %v1091_v8, %v1284_v34  ;;  %v409_v1 = vadd.f32 %v393_v19, %v341_v10 }
  0xa0   : > { %555 = vst [vmem:[%s1163_s10 + $0x58] sm:$0xff] %v539_v15  ;;  %v508_v27 = vsub.f32 0.0, %v476_v18  ;;  %vm493_vm13 = vcmp.lt.f32.partialorder %v1284_v34, 0.0  ;;  %v325_v11 = vmax.f32 %v309_v22, 0.0  ;;  %v377_v29 = vmax.f32 %v361_v23, 0.0 }
  0xa1   : > { %v445_v30 = vmax.f32 %v429_v53, 0.0  ;;  %v310_v13 = vsub.f32 %v291_v24, %v1099_v12  ;;  %v477_v32 = vadd.f32 %v461_v6, %v409_v1  ;;  %v362_v33 = vsub.f32 %v291_v24, %v1110_v17 }
  0xa2   : > { %v524_v63 = vsel %vm492_vm12, %v508_v27, %v476_v18  ;;  %v430_v7 = vsub.f32 %v291_v24, %v1116_v21  ;;  %v342_v36 = vmul.f32 %v1108_v16, %v325_v11  ;;  %v394_v37 = vmul.f32 %v1114_v20, %v377_v29 }
  0xa3   : > { %v540_v35 = vadd.f32 %v524_v63, %v272_v9  ;;  %v462_v38 = vmul.f32 %v1123_v28, %v445_v30  ;;  %v509_v39 = vsub.f32 0.0, %v477_v32  ;;  %v326_v40 = vmax.f32 %v310_v13, 0.0 }
  0xa4   : > { %v378_v41 = vmax.f32 %v362_v33, 0.0  ;;  %v446_v12 = vmax.f32 %v430_v7, 0.0  ;;  %v410_v26 = vadd.f32 %v394_v37, %v342_v36  ;;  %v274_v45 = vmul.f32 %v1091_v8, %v1302_v52 }
  0xa5   : > { %556 = vst [vmem:[%s1163_s10 + $0x60] sm:$0xff] %v540_v35  ;;  %v525_v43 = vsel %vm493_vm13, %v509_v39, %v477_v32  ;;  %v343_v17 = vmul.f32 %v1108_v16, %v326_v40  ;;  %vm494_vm14 = vcmp.lt.f32.partialorder %v1302_v52, 0.0  ;;  %vm495_vm15 = vcmp.lt.f32.partialorder %v257_v4, 0.0 }
  0xa6   : > { %v395_v21 = vmul.f32 %v1114_v20, %v378_v41  ;;  %v463_v14 = vmul.f32 %v1123_v28, %v446_v12  ;;  %v541_v44 = vadd.f32 %v525_v43, %v273_v0  ;;  %v478_v25 = vadd.f32 %v462_v38, %v410_v26 }
  0xa7   : > { %v275_v20 = vmul.f32 %v1091_v8, %v257_v4 }
  0xa8   : > { %v411_v46 = vadd.f32 %v395_v21, %v343_v17  ;;  %557 = vst [vmem:[%s1163_s10 + $0x68] sm:$0xff] %v541_v44  ;;  %v510_v34 = vsub.f32 0.0, %v478_v25 }
  0xaa   : > { %v479_v16 = vadd.f32 %v463_v14, %v411_v46  ;;  %v526_v47 = vsel %vm494_vm14, %v510_v34, %v478_v25 }
  0xab   : > { %v542_v28 = vadd.f32 %v526_v47, %v274_v45 }
  0xac   : > { %v511_v48 = vsub.f32 0.0, %v479_v16 }
  0xad   : > { %558 = vst [vmem:[%s1163_s10 + $0x70] sm:$0xff] %v542_v28 }
  0xae   : > { %v527_v49 = vsel %vm495_vm15, %v511_v48, %v479_v16 }
  0xaf   : > { %v543_v50 = vadd.f32 %v527_v49, %v275_v20 }
  0xb1   : > { %559 = vst [vmem:[%s1163_s10 + $0x78] sm:$0xff] %v543_v50 }
  0xb2   : > { %831 = shalt.err (!%p828_p2)
}
  0xb3   : > { %s832_s25 = scalar_lea.hbm %s1353_s21, 2048  ;;  %s836_s5 = scalar_lea.hbm %s1402_s4, 4096 }
  0xb4   : > { %p833_p10 = scmp.ne.s32.totalorder %s1353_s21, %s832_s25  ;;  %p837_p9 = scmp.lt.u32.totalorder %s1353_s21, %s1402_s4 }
  0xb5   : > { %p838_p4 = scmp.lt.u32.totalorder %s836_s5, %s832_s25  ;;  %p840_p6 = scmp.lt.u32.totalorder %s832_s25, %s1353_s21 }
  0xb6   : > { %p834_p5 = pnand %p833_p10, %p1005_p8 }
  0xb7   : > { %p839_p11 = por %p838_p4, %p837_p9 }
  0xb8   : > { %p835_p1 = pneg %p834_p5 }
  0xb9   : > { %p841_p13 = por %p840_p6, %p839_p11 }
  0xbb   : > { %p842_p3 = pnand %p841_p13, %p835_p1 }
  0xbd   : > { %845 = shalt.err (!%p842_p3)
}
  0xbe   : > { %701 = dma.vmem_to_hbm [thread:$0]  (%p1005_p8), %s1355_s12, 2048, %s1353_s21, %s561_s24  }
  0xbf PF: > { %s587_s22 = sand.u32 1, %s880_s17   ;;  %p1419_p7 = scmp.ne.s32.totalorder %s1407_s23, 0 }
  0xc0   : > { %p1420_p12 = scmp.ge.s32.totalorder %s892_s20, 2  ;;  %s588_s9 = scalar_lea.sflag [#allocation5], %s587_s22 }
  0xc2   : > { %p715_p0 = pnand %p1420_p12, %p1419_p7 }
  0xc4   : > { %875 = dma.done.wait (!%p715_p0), %s588_s9, 2048  }
  0xc5   : > { %877 = vsyncadd (!%p715_p0), %s588_s9, 4294965248  ;;  %p20_p2 = scmp.ge.s32.totalorder %s986_s6, 4   ;;  %s1421_s17 = smov %s884_s18 }
  0xc6   : > { %s1422_s18 = smov %s888_s19  ;;  %s1423_s19 = smov %s1001_s13 }
  0xc7   : > { %s1424_s20 = smov %s986_s6  ;;  %22 = sbr.rel (!%p20_p2) target bundleno = 9 (0x9), region = 90 }
  0xce   :  { %593 = vsyncpa [#allocation4], 1 }
  0xcf   :  { %595 = vsyncpa [#allocation4 + $0x1], 1 }
  0xd0   :  { %596 = vsyncpa [#allocation5], 1 }
  0xd1   :  { %598 = vsyncpa [#allocation5 + $0x1], 1 }
  0xd2   :  { %599 = vsyncpa [#allocation6], 1 }
  0xd3   :  { %601 = vsyncpa [#allocation6 + $0x1], 1 }
  0xd4   :  { %602 = vsyncpa [#allocation8], 1 }

</bundles_post_ra>
